<compile_context>
chip_gen: v7x
topology: tpu7x:2x2x1
jax: 0.10.0
libtpu: 0.0.40
codegen_flags: <defaults>
</compile_context>

<pallas_src>
import jax
import jax.numpy as jnp
from jax.experimental import pallas as pl
from jax.experimental.pallas import tpu as pltpu


# ----------------------------- configuration ------------------------------ #
NUM_ACTORS = 3            # len(config.role_names)
NUM_PHASES = 6            # len(config.phases)
NUM_TEMPORAL = NUM_PHASES + 2
SEQ_LEN = 8
PRED_LEN = 4
HIDDEN_DIMS = [64, 32]
BATCH = 2

INPUT_SIZE = NUM_ACTORS * SEQ_LEN + NUM_TEMPORAL      # 3*8 + 8 = 32
OUTPUT_SIZE = NUM_ACTORS * PRED_LEN                    # 12
BN_EPS = 1e-5


def _round_up(n, m):
    return ((n + m - 1) // m) * m


# Linear layers in execution order: input_layer, fc_0..fc_{n-1}, output_layer.
LAYER_DIMS = [(INPUT_SIZE, HIDDEN_DIMS[0])]
for _i in range(len(HIDDEN_DIMS) - 1):
    LAYER_DIMS.append((HIDDEN_DIMS[_i], HIDDEN_DIMS[_i + 1]))
LAYER_DIMS.append((HIDDEN_DIMS[-1], OUTPUT_SIZE))
N_LAYERS = len(LAYER_DIMS)

OUT_PAD = _round_up(OUTPUT_SIZE, 128)                      # lane-dense output
W_SLAB_COLS = max([OUT_PAD] + [n for (_, n) in LAYER_DIMS[:-1]])
W_SLAB_COLS = _round_up(W_SLAB_COLS, 128)

# Sublane-aligned row offsets of each layer's weight inside the weight slab.
W_ROW_OFFSETS = []
_off = 0
for (_k, _n) in LAYER_DIMS:
    W_ROW_OFFSETS.append(_off)
    _off += _round_up(_k, 8)
W_SLAB_ROWS = _round_up(_off, 8)


# ------------------------------ Pallas kernel ------------------------------ #
def _mlp_kernel(x_ref, w_ref, b_ref, o_ref):
    """x_ref: (B_pad, INPUT_SIZE) features, batch padded to a multiple of 8.
    w_ref: (W_SLAB_ROWS, W_SLAB_COLS) packed weights (BN pre-folded).
    b_ref: (N_LAYERS, W_SLAB_COLS) packed biases (BN pre-folded).
    o_ref: (B_pad, OUT_PAD) lane-dense output (zero beyond OUTPUT_SIZE lanes)."""
    h = x_ref[...]                                        # (B_pad, INPUT_SIZE)
    for li, (k, n) in enumerate(LAYER_DIMS):
        r0 = W_ROW_OFFSETS[li]
        n_lanes = OUT_PAD if li == N_LAYERS - 1 else n
        w = w_ref[r0:r0 + k, 0:n_lanes]                   # static sub-tile view
        b = b_ref[li:li + 1, 0:n_lanes]
        h = jnp.dot(h, w, preferred_element_type=jnp.float32) + b
        if li < N_LAYERS - 1:
            h = jnp.maximum(h, 0.0)                       # ReLU
        # dropout(p=0.1) -> identity (inference); BN_i folded into next layer.
    o_ref[...] = h.astype(o_ref.dtype)


# -------------------------- parameter packing ------------------------------ #
def pack_params(params):
    """Fold eval-mode BN into the following linear layer and pack everything
    into a single weight slab + a single bias slab (lane-128 aligned)."""
    n_pairs = len(HIDDEN_DIMS) - 1
    ws = [params["w_in"]]
    bs = [params["b_in"].reshape(-1)]
    for i in range(n_pairs):
        ws.append(params[f"w_fc{i}"])
        bs.append(params[f"b_fc{i}"].reshape(-1))
    ws.append(params["w_out"])
    bs.append(params["b_out"].reshape(-1))

    # BN_i follows fc_i (linear index i+1); fold its affine into linear i+2.
    for i in range(n_pairs):
        gamma = params[f"bn{i}_gamma"].reshape(-1)
        beta = params[f"bn{i}_beta"].reshape(-1)
        rmean = params[f"bn{i}_rmean"].reshape(-1)
        rvar = params[f"bn{i}_rvar"].reshape(-1)
        scale = gamma / jnp.sqrt(rvar + BN_EPS)
        shift = beta - rmean * scale
        j = i + 2
        bs[j] = bs[j] + shift @ ws[j]          # use un-scaled W for the shift
        ws[j] = scale[:, None] * ws[j]

    wslab = jnp.zeros((W_SLAB_ROWS, W_SLAB_COLS), jnp.float32)
    bslab = jnp.zeros((N_LAYERS, W_SLAB_COLS), jnp.float32)
    for li, ((k, n), w, b) in enumerate(zip(LAYER_DIMS, ws, bs)):
        r0 = W_ROW_OFFSETS[li]
        wslab = wslab.at[r0:r0 + k, 0:n].set(w)
        bslab = bslab.at[li, 0:n].set(b)
    return wslab, bslab


# --------------------------------- wrapper --------------------------------- #
@jax.jit
def mlp_pallas(x, wslab, bslab):
    """x: (B, num_actors + num_temporal, seq_len) float32.
    Returns (B, num_actors, pred_len)."""
    batch = x.shape[0]

    # Feature assembly (fused with the kernel launch under jit).
    hrv_in = x[:, :NUM_ACTORS, :].reshape(batch, -1)          # (B, A*T)
    temporal_in = x[:, NUM_ACTORS:, -1].reshape(batch, -1)    # (B, num_temporal)
    feats = jnp.concatenate([hrv_in, temporal_in], axis=1)    # (B, input_size)

    b_pad = _round_up(batch, 8)
    feats = jnp.pad(feats, ((0, b_pad - batch), (0, 0)))      # sublane-full

    out = pl.pallas_call(
        _mlp_kernel,
        out_shape=jax.ShapeDtypeStruct((b_pad, OUT_PAD), jnp.float32),
        in_specs=[pl.BlockSpec(memory_space=pltpu.MemorySpace.VMEM)] * 3,
        out_specs=pl.BlockSpec(memory_space=pltpu.MemorySpace.VMEM),
    )(feats, wslab, bslab)

    return out[:batch, :OUTPUT_SIZE].reshape(batch, NUM_ACTORS, PRED_LEN)


# ------------------------ parameter initialization ------------------------- #
def _kaiming_uniform(key, fan_in, fan_out):
    # torch.nn.init.kaiming_uniform_ default: bound = sqrt(6 / fan_in)
    bound = (6.0 / fan_in) ** 0.5
    # stored pre-transposed as (in, out) so the kernel computes x @ W
    return jax.random.uniform(key, (fan_in, fan_out), jnp.float32, -bound, bound)


def init_params(key):
    params = {}
    keys = jax.random.split(key, 2 + len(HIDDEN_DIMS))
    params["w_in"] = _kaiming_uniform(keys[0], INPUT_SIZE, HIDDEN_DIMS[0])
    params["b_in"] = jnp.zeros((1, HIDDEN_DIMS[0]), jnp.float32)
    for i in range(len(HIDDEN_DIMS) - 1):
        d_in, d_out = HIDDEN_DIMS[i], HIDDEN_DIMS[i + 1]
        params[f"w_fc{i}"] = _kaiming_uniform(keys[1 + i], d_in, d_out)
        params[f"b_fc{i}"] = jnp.zeros((1, d_out), jnp.float32)
        params[f"bn{i}_gamma"] = jnp.ones((1, d_out), jnp.float32)
        params[f"bn{i}_beta"] = jnp.zeros((1, d_out), jnp.float32)
        params[f"bn{i}_rmean"] = jnp.zeros((1, d_out), jnp.float32)
        params[f"bn{i}_rvar"] = jnp.ones((1, d_out), jnp.float32)
    params["w_out"] = _kaiming_uniform(keys[-1], HIDDEN_DIMS[-1], OUTPUT_SIZE)
    params["b_out"] = jnp.zeros((1, OUTPUT_SIZE), jnp.float32)
    return params


# ----------------------------- pure-JAX reference --------------------------- #
def mlp_reference(x, params):
    batch = x.shape[0]
    hrv_in = x[:, :NUM_ACTORS, :].reshape(batch, -1)
    temporal_in = x[:, NUM_ACTORS:, -1].reshape(batch, -1)
    h = jnp.concatenate([hrv_in, temporal_in], axis=1)
    h = jnp.maximum(h @ params["w_in"] + params["b_in"], 0.0)
    for i in range(len(HIDDEN_DIMS) - 1):
        h = jnp.maximum(h @ params[f"w_fc{i}"] + params[f"b_fc{i}"], 0.0)
        h = ((h - params[f"bn{i}_rmean"])
             / jnp.sqrt(params[f"bn{i}_rvar"] + BN_EPS)
             * params[f"bn{i}_gamma"] + params[f"bn{i}_beta"])
    out = h @ params["w_out"] + params["b_out"]
    return out.reshape(batch, NUM_ACTORS, PRED_LEN)


# ---------------------------------- main ----------------------------------- #
if __name__ == "__main__":
    key = jax.random.PRNGKey(0)
    k_param, k_x = jax.random.split(key)

    params = init_params(k_param)
    wslab, bslab = pack_params(params)

    x = jax.random.normal(
        k_x, (BATCH, NUM_ACTORS + NUM_TEMPORAL, SEQ_LEN), jnp.float32)

    out = mlp_pallas(x, wslab, bslab)
    out = jax.block_until_ready(out)

    ref = mlp_reference(x, params)
    assert out.shape == (BATCH, NUM_ACTORS, PRED_LEN), out.shape
    assert jnp.allclose(out, ref, atol=1e-5, rtol=1e-5), "mismatch vs reference"

    print("KERNEL_OK")
</pallas_src>

<mosaic_0001>
module attributes {stable_mosaic.version = 11 : i64} {
  func.func @_mlp_kernel(%arg0: memref<8x32xf32, #tpu.memory_space<vmem>>, %arg1: memref<128x128xf32, #tpu.memory_space<vmem>>, %arg2: memref<3x128xf32, #tpu.memory_space<vmem>>, %arg3: memref<8x128xf32, #tpu.memory_space<vmem>>) attributes {dimension_semantics = [], scalar_prefetch = 0 : i64, scratch_operands = 0 : i64, tpu.core_type = #tpu.core_type<tc>} {
    %c0 = arith.constant 0 : index
    %c0_0 = arith.constant 0 : index
    %0 = vector.load %arg0[%c0, %c0_0] : memref<8x32xf32, #tpu.memory_space<vmem>>, vector<8x32xf32>
    %c0_1 = arith.constant 0 : index
    %c0_2 = arith.constant 0 : index
    %1 = vector.load %arg1[%c0_1, %c0_2] : memref<128x128xf32, #tpu.memory_space<vmem>>, vector<32x64xf32>
    %c0_3 = arith.constant 0 : index
    %c0_4 = arith.constant 0 : index
    %2 = vector.load %arg2[%c0_3, %c0_4] : memref<3x128xf32, #tpu.memory_space<vmem>>, vector<1x64xf32>
    %cst = arith.constant dense<0.000000e+00> : vector<8x64xf32>
    %3 = tpu.matmul %0, %1, %cst {dimension_numbers = #tpu.dot_dimension_numbers<[1], [0], [0], [1], [0, 0, 1, 1], [], []>} : vector<8x32xf32>, vector<32x64xf32>, vector<8x64xf32> -> vector<8x64xf32>
    %4 = vector.broadcast %2 : vector<1x64xf32> to vector<8x64xf32>
    %5 = arith.addf %3, %4 : vector<8x64xf32>
    %cst_5 = arith.constant 0.000000e+00 : f32
    %6 = vector.broadcast %cst_5 : f32 to vector<8x64xf32>
    %7 = arith.maximumf %5, %6 : vector<8x64xf32>
    %c32 = arith.constant 32 : index
    %c0_6 = arith.constant 0 : index
    %8 = vector.load %arg1[%c32, %c0_6] : memref<128x128xf32, #tpu.memory_space<vmem>>, vector<64x32xf32>
    %c1 = arith.constant 1 : index
    %c0_7 = arith.constant 0 : index
    %9 = vector.load %arg2[%c1, %c0_7] : memref<3x128xf32, #tpu.memory_space<vmem>>, vector<1x32xf32>
    %cst_8 = arith.constant dense<0.000000e+00> : vector<8x32xf32>
    %10 = tpu.matmul %7, %8, %cst_8 {dimension_numbers = #tpu.dot_dimension_numbers<[1], [0], [0], [1], [0, 0, 1, 1], [], []>} : vector<8x64xf32>, vector<64x32xf32>, vector<8x32xf32> -> vector<8x32xf32>
    %11 = vector.broadcast %9 : vector<1x32xf32> to vector<8x32xf32>
    %12 = arith.addf %10, %11 : vector<8x32xf32>
    %cst_9 = arith.constant 0.000000e+00 : f32
    %13 = vector.broadcast %cst_9 : f32 to vector<8x32xf32>
    %14 = arith.maximumf %12, %13 : vector<8x32xf32>
    %c96 = arith.constant 96 : index
    %c0_10 = arith.constant 0 : index
    %15 = vector.load %arg1[%c96, %c0_10] : memref<128x128xf32, #tpu.memory_space<vmem>>, vector<32x128xf32>
    %c2 = arith.constant 2 : index
    %c0_11 = arith.constant 0 : index
    %16 = vector.load %arg2[%c2, %c0_11] : memref<3x128xf32, #tpu.memory_space<vmem>>, vector<1x128xf32>
    %cst_12 = arith.constant dense<0.000000e+00> : vector<8x128xf32>
    %17 = tpu.matmul %14, %15, %cst_12 {dimension_numbers = #tpu.dot_dimension_numbers<[1], [0], [0], [1], [0, 0, 1, 1], [], []>} : vector<8x32xf32>, vector<32x128xf32>, vector<8x128xf32> -> vector<8x128xf32>
    %18 = vector.broadcast %16 : vector<1x128xf32> to vector<8x128xf32>
    %19 = arith.addf %17, %18 : vector<8x128xf32>
    %c0_13 = arith.constant 0 : index
    %c0_14 = arith.constant 0 : index
    %20 = vector.load %arg3[%c0_13, %c0_14] : memref<8x128xf32, #tpu.memory_space<vmem>>, vector<8x128xf32>
    tpu.vector_store %arg3[%c0_13, %c0_14], %19 {strides = array<i32>} : memref<8x128xf32, #tpu.memory_space<vmem>>, vector<8x128xf32>,
    return
  }
}

</mosaic_0001>

<bundles_post_ra>
// kernel: mlp_pallas.1
= control target key start
LH: loop header
LB: loop body
LE: loop exit
PB: predicated region body
PF: predicated region fallthrough
CT: control target
= control target key end

     0   :  { %8 = vsyncpa [#allocation3], 0  ;;  %s409_s12 = smov [#allocation2]   ;;  %s467_s0 = inlined_call_operand.vmem [shape: f32[8,32], index: 0, kind: input, shape index: {}]   ;;  %s468_s1 = inlined_call_operand.hbm [shape: f32[128,128], index: 1, kind: input, shape index: {}]   ;;  %s469_s2 = inlined_call_operand.vmem [shape: f32[3,128], index: 2, kind: input, shape index: {}]   ;;  %s470_s3 = inlined_call_operand.vmem [shape: f32[8,128], index: 3, kind: output, shape index: {}]  }
   0x1   :  { %s16_s13 = sshll.u32 %s409_s12, 4  ;;  %s385_s16 = scalar_lea.hbm %s468_s1, 2048  ;;  %s17_s13 = int_to_ptr.vmem [resolvable:$true] %s16_s13 }
   0x2   :  { %p386_p0 = scmp.ne.s32.totalorder %s468_s1, %s385_s16  ;;  %p389_p1 = scmp.lt.u32.totalorder %s385_s16, %s468_s1 }
   0x4   :  { %p391_p2 = pnand %p389_p1, %p386_p0 }
   0x6   :  { %394 = shalt.err (!%p391_p2)
}
   0x7   :  { %s395_s21 = scalar_lea.vmem %s17_s13, 2048  ;;  %p400_p4 = scmp.lt.s32.totalorder %s17_s13, %s17_s13 }
   0x8   :  { %p396_p3 = scmp.ne.s32.totalorder %s17_s13, %s395_s21  ;;  %p401_p5 = scmp.lt.s32.totalorder %s395_s21, %s395_s21 }
   0xa   :  { %p402_p6 = por %p401_p5, %p400_p4 }
   0xc   :  { %p403_p7 = pnand %p402_p6, %p396_p3 }
   0xe   :  { %406 = shalt.err (!%p403_p7)
}
   0xf   :  { %s410_s22 = smov 128   ;;  %s411_s23 = smov 8  }
  0x10   :  { %22 = dma.hbm_to_vmem [thread:$0]  %s468_s1, 2048, %s17_s13, [#allocation3], %s410_s22, %s410_s22, %s411_s23  }
  0x11   :  { %407 = dma.done.wait [#allocation3], 2048  }
  0x12   :  { %408 = vsyncadd [#allocation3], 4294965248  ;;  %v412_v0 = vmov 0.0|0.0   ;;  %vm413_vm0 = vmmov 0   ;;  %v414_v1 = vmov 0.0   ;;  %v29_v2 = vld [vmem:[#allocation2] sm:$0xff] }
  0x13   :  { %355 = vmatprep.subr.bf16.mxu0 %v412_v0  ;;  %322 = vmatprep.mubr.msk.f32.mxu0 %vm413_vm0, %v414_v1  ;;  %v30_v3 = vld [vmem:[#allocation2 + $0x8] sm:$0xff]  ;;  %v31_v4 = vld [vmem:[#allocation2 + $0x10] sm:$0xff]  ;;  %v32_v6 = vld [vmem:[#allocation2 + $0x18] sm:$0xff]  ;;  %vm38_vm1 = vcmask 261120   ;;  %vm126_vm2 = vcmask 523264  }
  0x14   :  { %361 = vmatprep.subr.bf16.mxu1 %v412_v0  ;;  %341 = vmatprep.mubr.msk.f32.mxu1 %vm413_vm0, %v414_v1  ;;  %v356_v5 = vpack.c.bf16 %v30_v3, %v29_v2  ;;  %v113_v7 = vld [vmem:[#allocation2 + $0x20] sm:$0xff]  ;;  %v114_v8 = vld [vmem:[#allocation2 + $0x28] sm:$0xff]  ;;  %v115_v9 = vld [vmem:[#allocation2 + $0x30] sm:$0xff]  ;;  %v359_v11 = vpack.c.bf16 %v32_v6, %v31_v4 }
  0x15   :  { %v116_v10 = vld [vmem:[#allocation2 + $0x38] sm:$0xff]  ;;  %v362_v12 = vpack.c.bf16 %v114_v8, %v113_v7  ;;  %v117_v14 = vld [vmem:[#allocation2 + $0x40] sm:$0xff]  ;;  %v118_v15 = vld [vmem:[#allocation2 + $0x48] sm:$0xff] }
  0x16   :  { %357 = vmatpush3.bf16.msra.mxu0 %v356_v5  ;;  %v365_v13 = vpack.c.bf16 %v116_v10, %v115_v9  ;;  %v28_v16 = vld [vmem:[%s467_s0] sm:$0xff]  ;;  %v368_v17 = vpack.c.bf16 %v118_v15, %v117_v14  ;;  %v119_v18 = vld [vmem:[#allocation2 + $0x50] sm:$0xff]  ;;  %v120_v19 = vld [vmem:[#allocation2 + $0x58] sm:$0xff] }
  0x17   :  { %358 = vmatprep.subr.bf16.mxu0 %v412_v0  ;;  %363 = vmatpush3.bf16.msra.mxu1 %v362_v12  ;;  %v371_v20 = vpack.c.bf16 %v120_v19, %v119_v18  ;;  %v201_v21 = vld [vmem:[#allocation2 + $0x60] sm:$0xff]  ;;  %v202_v22 = vld [vmem:[#allocation2 + $0x68] sm:$0xff]  ;;  %v203_v29 = vld [vmem:[#allocation2 + $0x70] sm:$0xff] }
  0x18   :  { %364 = vmatprep.subr.bf16.mxu1 %v412_v0  ;;  %v374_v23 = vpack.c.bf16 %v202_v22, %v201_v21  ;;  %v289_v24 = vld [vmem:[%s469_s2] ss:$0 sm:$0xff]  ;;  %v204_v30 = vld [vmem:[#allocation2 + $0x78] sm:$0xff]  ;;  %v291_v32 = vld [vmem:[%s469_s2 + $0x1] ss:$0 sm:$0xff] }
  0x19   :  { %v377_v31 = vpack.c.bf16 %v204_v30, %v203_v29  ;;  %v293_v37 = vld [vmem:[%s469_s2 + $0x2] ss:$0 sm:$0xff] }
  0x1a   :  { %360 = vmatpush3.bf16.msra.mxu0 %v359_v11 }
  0x1b   :  { %373 = vmatprep.subr.bf16.mxu0 %v412_v0  ;;  %366 = vmatpush3.bf16.msra.mxu1 %v365_v13 }
  0x1c   :  { %367 = vmatprep.subr.bf16.mxu1 %v412_v0 }
  0x1d   :  { %323 = vmatmul.mubr.msk.f32.vlgmr.msra.gmra.mrb[0].mxu0 %vm38_vm1, %v28_v16 }
  0x1e   :  { %352 = vmatprep.mubr.msk.f32.mxu0 %vm413_vm0, %v414_v1  ;;  %375 = vmatpush3.bf16.msra.mxu0 %v374_v23 }
  0x1f   :  { %369 = vmatpush3.bf16.msra.mxu1 %v368_v17  ;;  %376 = vmatprep.subr.bf16.mxu0 %v412_v0 }
  0x20   :  { %370 = vmatprep.subr.bf16.mxu1 %v412_v0 }
  0x22   :  { %378 = vmatpush3.bf16.msra.mxu0 %v377_v31 }
  0x23   :  { %372 = vmatpush3.bf16.msra.mxu1 %v371_v20 }
  0xf0   :  { %v108_v25 = vpop.f32.mrb[0].mxu0 }
  0xf1   :  { %v109_v26 = vadd.f32 %v289_v24, %v108_v25  ;;  %v324_v27 = vpop.f32.mrb[1].mxu0 }
  0xf3   :  { %v112_v28 = vmax.f32 %v109_v26, 0.0 }
  0xf5   :  { %342 = vmatmul.mubr.msk.f32.vlgmr.msra.gmra.mrb[0].mxu1 %vm126_vm2, %v112_v28 }
 0x1c8   :  { %v196_v33 = vpop.f32.mrb[0].mxu1 }
 0x1c9   :  { %v197_v34 = vadd.f32 %v291_v32, %v196_v33  ;;  %v343_v35 = vpop.f32.mrb[1].mxu1 }
 0x1cb   :  { %v200_v36 = vmax.f32 %v197_v34, 0.0 }
 0x1cd   :  { %353 = vmatmul.mubr.msk.f32.vlgmr.msra.gmra.mrb[2].mxu0 %vm38_vm1, %v200_v36 }
 0x2a0   :  { %v279_v38 = vpop.f32.mrb[2].mxu0 }
 0x2a1   :  { %v280_v39 = vadd.f32 %v293_v37, %v279_v38  ;;  %v354_v40 = vpop.f32.mrb[3].mxu0 }
 0x2a3   :  { %283 = vst [vmem:[%s470_s3] sm:$0xff] %v280_v39 }
 0x2a4   :  { %288 = vsyncpa [#allocation3], 1 }

</bundles_post_ra>
